<compile_context>
chip_gen: v5e
topology: v5e:2x2
jax: 0.10.0
libtpu: 0.0.40
codegen_flags: <defaults>
</compile_context>

<pallas_src>
import jax
import jax.numpy as jnp
from jax.experimental import pallas as pl
from jax.experimental.pallas import tpu as pltpu

LANES = 128
MAX_TILE_ROWS = 8192                 # (8192,128) f32 = 4 MiB per buffer
VMEM_LIMIT_BYTES = 40 * 1024 * 1024  # room for double-buffered in+out on every gen


def _round_up(n, m):
    return ((n + m - 1) // m) * m


def _bits_to_uniform(bits):
    """uint32 random bits -> U[0,1) float32 via the mantissa trick (pure VPU work)."""
    u = pltpu.bitcast(bits, jnp.uint32)
    mant = (u >> 9) | jnp.uint32(0x3F800000)        # float bits in [1, 2)
    return pltpu.bitcast(mant, jnp.float32) - 1.0   # [0, 1)


def _gumbel_hw_prng_kernel(seed_ref, x_ref, o_ref):
    """TPU-only path: noise generated in-kernel -> HBM traffic = read x + write mask."""
    pltpu.prng_seed(seed_ref[0], seed_ref[1], pl.program_id(0))
    x = x_ref[...].astype(jnp.float32)
    u = _bits_to_uniform(pltpu.prng_random_bits(x.shape))
    # Forward value of the straight-through output with Gumbel noise:
    #   x + g1 - g2 >= 0   (g1,g2 ~ Gumbel(0,1), any temperature > 0)
    #   <=>  u < sigmoid(x)  <=>  u * (1 + exp(-x)) < 1
    o_ref[...] = (u * (1.0 + jnp.exp(-x)) < 1.0).astype(o_ref.dtype)


def _gumbel_uniform_in_kernel(x_ref, u_ref, o_ref):
    """Portable path (CPU / interpret): uniform noise is a second kernel input."""
    x = x_ref[...].astype(jnp.float32)
    o_ref[...] = (u_ref[...] * (1.0 + jnp.exp(-x)) < 1.0).astype(o_ref.dtype)


def _seed_words(key):
    """Two int32 seed words straight from the key material (no extra randint launch)."""
    if hasattr(key, "dtype") and jnp.issubdtype(key.dtype, jax.dtypes.prng_key):
        raw = jax.random.key_data(key)
    else:
        raw = jnp.asarray(key)
    raw = raw.reshape(-1).astype(jnp.uint32)
    if raw.shape[0] < 2:
        raw = jnp.concatenate([raw, jnp.zeros((2,), jnp.uint32)])
    return jax.lax.bitcast_convert_type(raw[:2], jnp.int32)


def gumbel_forward(x, gumbel_temp=1.0, gumbel_noise=True, training=True,
                   eps=1e-8, key=None, out_dtype=jnp.float32, use_hw_prng=None):
    """Pallas implementation of Gumbel.forward (forward value of the module).

    `gumbel_temp` does not change the forward value (sigmoid(z/T) >= 0.5 is a
    sign test for any T > 0); `eps` is unneeded in the compare-form rewrite.
    Both are kept for API parity.
    """
    del gumbel_temp, eps

    if not (training and gumbel_noise):
        # eval path ((x >= 0).float()) and no-noise training path
        # (sigmoid(x/T) >= 0.5 <=> x >= 0): plain XLA sign test, fuses for free.
        return (x >= 0).astype(out_dtype)

    if key is None:
        key = jax.random.PRNGKey(0)

    orig_shape = x.shape
    flat = x.reshape(-1)
    n = flat.shape[0]

    # Pad only to a small row alignment (not a full tile) -- skipped when exact.
    row_align = 8 if (x.dtype.itemsize >= 4 and jnp.dtype(out_dtype).itemsize >= 4) else 16
    rows = _round_up(pl.cdiv(n, LANES), row_align)
    padded = rows * LANES
    if padded != n:
        flat = jnp.pad(flat, (0, padded - n))
    slab = flat.reshape(rows, LANES)

    # Block = full array when it fits; otherwise large aligned tiles with the
    # partial trailing block masked by Pallas (no wrapper-side over-padding).
    tile_rows = rows if rows <= MAX_TILE_ROWS else MAX_TILE_ROWS
    grid_n = pl.cdiv(rows, tile_rows)

    on_tpu = jax.default_backend() == "tpu"
    if use_hw_prng is None:
        use_hw_prng = on_tpu

    if on_tpu and grid_n > 1:
        # shard multi-block launches across both v7x TensorCores (1-TC chips: no-op)
        dims = (getattr(pltpu, "CORE_PARALLEL", "parallel"),)
    else:
        dims = ("arbitrary",)
    cparams = pltpu.CompilerParams(dimension_semantics=dims,
                                   vmem_limit_bytes=VMEM_LIMIT_BYTES)
    out_shape = jax.ShapeDtypeStruct((rows, LANES), out_dtype)

    if use_hw_prng:
        # In-kernel hardware PRNG: only HBM traffic is read x + write mask.
        seeds = _seed_words(key)
        blk = pl.BlockSpec((tile_rows, LANES), lambda i, seeds_ref: (i, 0))
        out_slab = pl.pallas_call(
            _gumbel_hw_prng_kernel,
            out_shape=out_shape,
            grid_spec=pltpu.PrefetchScalarGridSpec(
                num_scalar_prefetch=1,      # seeds land in SMEM
                grid=(grid_n,),
                in_specs=[blk],
                out_specs=blk),
            compiler_params=cparams,
        )(seeds, slab)
    else:
        # Portable fallback: one uniform per element, generated outside, streamed in.
        u = jax.random.uniform(key, (rows, LANES), dtype=jnp.float32)
        blk = pl.BlockSpec((tile_rows, LANES), lambda i: (i, 0))
        out_slab = pl.pallas_call(
            _gumbel_uniform_in_kernel,
            out_shape=out_shape,
            grid=(grid_n,),
            in_specs=[blk, blk],
            out_specs=pl.BlockSpec((tile_rows, LANES), lambda i: (i, 0)),
            compiler_params=cparams,
        )(slab, u)

    flat_out = out_slab.reshape(-1)
    if padded != n:
        flat_out = flat_out[:n]
    return flat_out.reshape(orig_shape)


# TODO(synk): the straight-through gradient ((hard - soft).detach() + soft) is a
# backward-pass construct; only the forward value is implemented here.


if __name__ == "__main__":
    key = jax.random.PRNGKey(0)
    kx, knoise = jax.random.split(key)
    # x is the soft mask logits tensor (NCHW in the original code path)
    x = jax.random.normal(kx, (2, 4, 16, 16), dtype=jnp.float32)

    # training path with gumbel noise (default forward behavior) -> Pallas kernel
    hard_train = gumbel_forward(x, gumbel_temp=1.0, gumbel_noise=True,
                                training=True, key=knoise)
    jax.block_until_ready(hard_train)
    assert hard_train.shape == x.shape
    assert hard_train.dtype == jnp.float32
    assert not bool(jnp.any(jnp.isnan(hard_train)))
    # output must be exactly 0/1
    assert bool(jnp.all((hard_train == 0.0) | (hard_train == 1.0)))
    # the mask is Bernoulli(sigmoid(x)) elementwise -> sample mean sanity check
    p_mean = float(jax.nn.sigmoid(x).mean())
    assert abs(float(hard_train.mean()) - p_mean) < 0.1

    # eval path: (x >= 0).float()
    hard_eval = gumbel_forward(x, training=False)
    jax.block_until_ready(hard_eval)
    assert bool(jnp.all(hard_eval == (x >= 0).astype(jnp.float32)))

    # no-noise training path must match the pure-JAX reference
    ref = (jax.nn.sigmoid(x / 1.0) >= 0.5).astype(jnp.float32)
    hard_nonoise = gumbel_forward(x, gumbel_noise=False, training=True)
    jax.block_until_ready(hard_nonoise)
    assert bool(jnp.all(hard_nonoise == ref))

    # ragged element count (not a multiple of 128) -> exercises the tail-pad path
    x2 = jax.random.normal(kx, (2, 3, 7, 5), dtype=jnp.float32)
    out2 = gumbel_forward(x2, gumbel_noise=True, training=True, key=knoise)
    jax.block_until_ready(out2)
    assert out2.shape == x2.shape
    assert bool(jnp.all((out2 == 0.0) | (out2 == 1.0)))

    print("KERNEL_OK")
</pallas_src>

<mosaic_0001>
module attributes {stable_mosaic.version = 11 : i64} {
  func.func @_gumbel_uniform_in_kernel(%arg0: i32, %arg1: memref<16x128xf32, #tpu.memory_space<vmem>>, %arg2: memref<16x128xf32, #tpu.memory_space<vmem>>, %arg3: memref<16x128xf32, #tpu.memory_space<vmem>>) attributes {dimension_semantics = [#tpu.dimension_semantics<arbitrary>], iteration_bounds = array<i64: 1>, scalar_prefetch = 0 : i64, scratch_operands = 0 : i64, tpu.core_type = #tpu.core_type<tc>, window_params = [{transform_indices = @transform_0, window_bounds = array<i64: 16, 128>}, {transform_indices = @transform_1, window_bounds = array<i64: 16, 128>}, {transform_indices = @transform_2, window_bounds = array<i64: 16, 128>}]} {
    %c0 = arith.constant 0 : index
    %c0_0 = arith.constant 0 : index
    %0 = vector.load %arg1[%c0, %c0_0] : memref<16x128xf32, #tpu.memory_space<vmem>>, vector<16x128xf32>
    %c0_1 = arith.constant 0 : index
    %c0_2 = arith.constant 0 : index
    %1 = vector.load %arg2[%c0_1, %c0_2] : memref<16x128xf32, #tpu.memory_space<vmem>>, vector<16x128xf32>
    %cst = arith.constant 0.000000e+00 : f32
    %2 = vector.broadcast %cst : f32 to vector<16x128xf32>
    %3 = arith.subf %2, %0 : vector<16x128xf32>
    %4 = math.exp %3 : vector<16x128xf32>
    %cst_3 = arith.constant 1.000000e+00 : f32
    %5 = vector.broadcast %cst_3 : f32 to vector<16x128xf32>
    %6 = arith.addf %5, %4 : vector<16x128xf32>
    %7 = arith.mulf %1, %6 : vector<16x128xf32>
    %cst_4 = arith.constant 1.000000e+00 : f32
    %8 = vector.broadcast %cst_4 : f32 to vector<16x128xf32>
    %9 = arith.cmpf olt, %7, %8 : vector<16x128xf32>
    %10 = arith.extui %9 : vector<16x128xi1> to vector<16x128xi32>
    %11 = arith.sitofp %10 : vector<16x128xi32> to vector<16x128xf32>
    %c0_5 = arith.constant 0 : index
    %c0_6 = arith.constant 0 : index
    %12 = vector.load %arg3[%c0_5, %c0_6] : memref<16x128xf32, #tpu.memory_space<vmem>>, vector<16x128xf32>
    tpu.vector_store %arg3[%c0_5, %c0_6], %11 {strides = array<i32>} : memref<16x128xf32, #tpu.memory_space<vmem>>, vector<16x128xf32>,
    return
  }
  func.func @transform_0(%arg0: i32) -> (i32, i32) {
    %c0_i32 = arith.constant 0 : i32
    %c0_i32_0 = arith.constant 0 : i32
    return %arg0, %c0_i32 : i32, i32
  }
  func.func @transform_1(%arg0: i32) -> (i32, i32) {
    %c0_i32 = arith.constant 0 : i32
    %c0_i32_0 = arith.constant 0 : i32
    return %arg0, %c0_i32 : i32, i32
  }
  func.func @transform_2(%arg0: i32) -> (i32, i32) {
    %c0_i32 = arith.constant 0 : i32
    %c0_i32_0 = arith.constant 0 : i32
    return %arg0, %c0_i32 : i32, i32
  }
}

</mosaic_0001>

<bundles_post_ra>
// kernel: tpu_custom_call.1
= control target key start
LH: loop header
LB: loop body
LE: loop exit
PB: predicated region body
PF: predicated region fallthrough
CT: control target
= control target key end

     0   :  { %7 = vsyncpa [#allocation3], 0  ;;  %s215_s0 = inlined_call_operand.hbm [shape: f32[16,128], index: 0, kind: input, shape index: {}]   ;;  %s216_s1 = inlined_call_operand.hbm [shape: f32[16,128], index: 1, kind: input, shape index: {}]   ;;  %s217_s2 = inlined_call_operand.hbm [shape: f32[16,128], index: 2, kind: output, shape index: {}]  }
   0x1   :  { %8 = vsyncpa [#allocation6], 0 }
   0x2   :  { %9 = vsyncpa [#allocation4], 0  ;;  %s14_s11 = sshll.u32 %s215_s0, 4  ;;  %s176_s12 = smov [#allocation2]   ;;  %s15_s11 = int_to_ptr.hbm [resolvable:$true] %s14_s11 }
   0x3   :  { %s16_s13 = sshll.u32 %s176_s12, 4  ;;  %s27_s16 = sshll.u32 %s216_s1, 4  ;;  %s17_s13 = int_to_ptr.vmem [resolvable:$true] %s16_s13  ;;  %s28_s16 = int_to_ptr.hbm [resolvable:$true] %s27_s16 }
   0x4   :  { %s177_s17 = smov 128   ;;  %s178_s18 = smov 8  }
   0x5   :  { %22 = dma.hbm_to_vmem [thread:$0]  %s15_s11, 256, %s17_s13, [#allocation3], %s177_s17, %s177_s17, %s178_s18  }
   0x6   :  { %s179_s19 = smov [#allocation5]  }
   0x7   :  { %s29_s20 = sshll.u32 %s179_s19, 4  ;;  %s30_s20 = int_to_ptr.vmem [resolvable:$true] %s29_s20 }
   0x8   :  { %35 = dma.hbm_to_vmem [thread:$0]  %s28_s16, 256, %s30_s20, [#allocation6], %s177_s17, %s177_s17, %s178_s18  }
   0x9   :  { %170 = dma.done.wait [#allocation3], 256  }
   0xa   :  { %171 = vsyncadd [#allocation3], 4294967040 }
   0xb   :  { %172 = dma.done.wait [#allocation6], 256  }
   0xc   :  { %173 = vsyncadd [#allocation6], 4294967040  ;;  %v44_v0 = vld [vmem:[#allocation2] sm:$0xff]  ;;  %v45_v1 = vld [vmem:[#allocation2 + $0x8] sm:$0xff]  ;;  %s180_s0 = smov [#allocation7]   ;;  %s72_s23 = sshll.u32 %s217_s2, 4  ;;  %s73_s23 = int_to_ptr.hbm [resolvable:$true] %s72_s23 }
   0xd   :  { %v48_v2 = vsub.f32 0.0, %v44_v0  ;;  %v49_v3 = vsub.f32 0.0, %v45_v1  ;;  %v46_v7 = vld [vmem:[#allocation5] sm:$0xff]  ;;  %v47_v10 = vld [vmem:[#allocation5 + $0x8] sm:$0xff]  ;;  %s70_s1 = sshll.u32 %s180_s0, 4  ;;  %v181_v14 = vmov 0.0   ;;  %s71_s1 = int_to_ptr.vmem [resolvable:$true] %s70_s1 }
   0xf   :  { %v50_v4 = vmul.f32 1.442695, %v48_v2  ;;  %v52_v5 = vmul.f32 1.442695, %v49_v3 }
  0x11   :  { %94 = vpow2.f32 %v50_v4 }
  0x12   :  { %96 = vpow2.f32 %v52_v5 }
  0x17   :  { %v95_v6 = vpop.eup %94 }
  0x18   :  { %v97_v8 = vpop.eup %96  ;;  %v54_v9 = vadd.f32 1.0, %v95_v6 }
  0x19   :  { %v55_v11 = vadd.f32 1.0, %v97_v8 }
  0x1a   :  { %v56_v12 = vmul.f32 %v54_v9, %v46_v7 }
  0x1b   :  { %v57_v13 = vmul.f32 %v55_v11, %v47_v10 }
  0x1c   :  { %vm58_vm0 = vcmp.lt.f32.partialorder %v56_v12, 1.0 }
  0x1d   :  { %v86_v15 = vsel %vm58_vm0, 1.0, %v181_v14  ;;  %vm59_vm1 = vcmp.lt.f32.partialorder %v57_v13, 1.0 }
  0x1e   :  { %64 = vst [vmem:[#allocation7] sm:$0xff] %v86_v15  ;;  %v87_v16 = vsel %vm59_vm1, 1.0, %v181_v14 }
  0x1f   :  { %65 = vst [vmem:[#allocation7 + $0x8] sm:$0xff] %v87_v16 }
  0x20   :  { %78 = dma.vmem_to_hbm [thread:$0]  %s71_s1, 256, %s73_s23, [#allocation4], %s177_s17, %s177_s17, %s178_s18  }
  0x21   :  { %174 = dma.done.wait [#allocation4], 256  }
  0x22   :  { %175 = vsyncadd [#allocation4], 4294967040 }
  0x23   :  { %83 = vsyncpa [#allocation3], 1 }
  0x24   :  { %84 = vsyncpa [#allocation6], 1 }
  0x25   :  { %85 = vsyncpa [#allocation4], 1 }

</bundles_post_ra>
